<compile_context>
chip_gen: v6e
topology: v6e:2x2x1
jax: 0.10.0
libtpu: 0.0.40
codegen_flags: <defaults>
</compile_context>

<pallas_src>
import jax
import jax.numpy as jnp
from jax.experimental import pallas as pl
from jax.experimental.pallas import tpu as pltpu

INPUT_SIZE = 10
HIDDEN_SIZE = 100
OUTPUT_SIZE = 4

HIDDEN_PAD = 128   # lane-dense hidden width (MXU/VPU friendly)


def _round_up(n, m):
    return ((n + m - 1) // m) * m


def fizbuz_kernel(x_ref, w1_ref, b1_ref, w2_ref, b2_ref, o_ref):
    # x: (TM, 10) f32 or bf16 -> bf16 in-register for the MXU.
    x = x_ref[...].astype(jnp.bfloat16)
    # layer 1: (TM,10) @ (10,128), bf16 MXU inputs, f32 accumulation, f32 bias add.
    h = jnp.dot(x, w1_ref[...], preferred_element_type=jnp.float32) + b1_ref[...]
    a = jax.nn.sigmoid(h)                                   # EUP transcendental path
    # layer 2: (TM,128) @ (128,128), bf16 MXU inputs, f32 accumulation.
    out = jnp.dot(a.astype(jnp.bfloat16), w2_ref[...],
                  preferred_element_type=jnp.float32)
    # Store only the 4 real output columns (narrow HBM write, 16 B/row).
    o_ref[...] = (out[:, :OUTPUT_SIZE] + b2_ref[...]).astype(o_ref.dtype)


def fizbuz_forward(x, w1, b1, w2, b2, *, tm=8192):
    """x: (B, 10); w1: (10, 100); b1: (1, 100); w2: (100, 4); b2: (1, 4).
    Returns (B, 4) f32 == sigmoid(x @ w1 + b1) @ w2 + b2
    (bf16 MXU inputs, f32 accumulation)."""
    B = x.shape[0]
    b1 = jnp.reshape(b1, (1, HIDDEN_SIZE))
    b2 = jnp.reshape(b2, (1, OUTPUT_SIZE))

    # Batch tiling: whole batch in one block if it fits (block dim == full dim is
    # always legal), otherwise 8-row-aligned tiles of at most `tm` rows.
    if B <= tm:
        TM = B
    else:
        TM = _round_up(min(tm, B), 8)
    grid_b = pl.cdiv(B, TM)
    B_pad = grid_b * TM

    if B_pad == B:
        x_p = x                                              # no extra pass over x
    else:
        # Fused pad + bf16 cast (single XLA op); kernel's astype is then a no-op.
        x_p = jnp.pad(x, ((0, B_pad - B), (0, 0))).astype(jnp.bfloat16)

    # Weights/biases: tiny, padded + cast once on the wrapper side, resident in VMEM.
    w1_p = jnp.pad(w1, ((0, 0), (0, HIDDEN_PAD - HIDDEN_SIZE))).astype(jnp.bfloat16)     # (10, 128)
    b1_p = jnp.pad(b1, ((0, 0), (0, HIDDEN_PAD - HIDDEN_SIZE))).astype(jnp.float32)      # (1, 128)
    w2_p = jnp.pad(w2, ((0, HIDDEN_PAD - HIDDEN_SIZE),
                        (0, HIDDEN_PAD - OUTPUT_SIZE))).astype(jnp.bfloat16)              # (128, 128)
    b2_p = b2.astype(jnp.float32)                                                         # (1, 4)

    out = pl.pallas_call(
        fizbuz_kernel,
        out_shape=jax.ShapeDtypeStruct((B_pad, OUTPUT_SIZE), jnp.float32),
        grid=(grid_b,),
        in_specs=[
            # x tiled along the batch axis
            pl.BlockSpec((TM, INPUT_SIZE), lambda i: (i, 0)),
            # weights/biases: whole array, constant index_map -> resident, no re-DMA
            pl.BlockSpec((INPUT_SIZE, HIDDEN_PAD), lambda i: (0, 0)),
            pl.BlockSpec((1, HIDDEN_PAD), lambda i: (0, 0)),
            pl.BlockSpec((HIDDEN_PAD, HIDDEN_PAD), lambda i: (0, 0)),
            pl.BlockSpec((1, OUTPUT_SIZE), lambda i: (0, 0)),
        ],
        out_specs=pl.BlockSpec((TM, OUTPUT_SIZE), lambda i: (i, 0)),
        compiler_params=pltpu.CompilerParams(
            dimension_semantics=("parallel",)),   # batch tiles shard across TCs on v7x
    )(x_p, w1_p, b1_p, w2_p, b2_p)

    return out if B_pad == B else out[:B]


def init_params(key):
    # Mimic PyTorch nn.Linear default init: U(-1/sqrt(fan_in), +1/sqrt(fan_in)),
    # stored as (in, out) so the kernel computes x @ W (== PyTorch x @ W.T, W (out, in)).
    k1, k2, k3, k4 = jax.random.split(key, 4)
    bound1 = 1.0 / jnp.sqrt(jnp.float32(INPUT_SIZE))
    bound2 = 1.0 / jnp.sqrt(jnp.float32(HIDDEN_SIZE))
    w1 = jax.random.uniform(k1, (INPUT_SIZE, HIDDEN_SIZE), jnp.float32, -bound1, bound1)
    b1 = jax.random.uniform(k2, (1, HIDDEN_SIZE), jnp.float32, -bound1, bound1)
    w2 = jax.random.uniform(k3, (HIDDEN_SIZE, OUTPUT_SIZE), jnp.float32, -bound2, bound2)
    b2 = jax.random.uniform(k4, (1, OUTPUT_SIZE), jnp.float32, -bound2, bound2)
    return w1, b1, w2, b2


if __name__ == "__main__":
    key = jax.random.PRNGKey(0)
    kx, kp = jax.random.split(key)

    batch = 100
    x = jax.random.uniform(kx, (batch, INPUT_SIZE), jnp.float32)
    w1, b1, w2, b2 = init_params(kp)

    # Reference in plain f32 JAX; kernel uses bf16 MXU inputs with f32 accumulation,
    # so allow bf16-level tolerance.
    ref = jax.nn.sigmoid(x @ w1 + b1) @ w2 + b2

    # Path 1: multi-tile grid (tm=64 -> TM=64, 2 grid steps, batch padded 100 -> 128).
    out_tiled = jax.block_until_ready(fizbuz_forward(x, w1, b1, w2, b2, tm=64))
    # Path 2: default tile (whole batch in one block, no batch padding, no slicing).
    out_single = jax.block_until_ready(fizbuz_forward(x, w1, b1, w2, b2))

    for out in (out_tiled, out_single):
        assert out.shape == (batch, OUTPUT_SIZE)
        assert jnp.allclose(out, ref, atol=2e-2, rtol=2e-2), float(jnp.max(jnp.abs(out - ref)))

    print("KERNEL_OK")
</pallas_src>

<mosaic_0001>
module attributes {stable_mosaic.version = 11 : i64} {
  func.func @fizbuz_kernel(%arg0: i32, %arg1: memref<64x10xbf16, #tpu.memory_space<vmem>>, %arg2: memref<10x128xbf16, #tpu.memory_space<vmem>>, %arg3: memref<1x128xf32, #tpu.memory_space<vmem>>, %arg4: memref<128x128xbf16, #tpu.memory_space<vmem>>, %arg5: memref<1x4xf32, #tpu.memory_space<vmem>>, %arg6: memref<64x4xf32, #tpu.memory_space<vmem>>) attributes {dimension_semantics = [#tpu.dimension_semantics<parallel>], iteration_bounds = array<i64: 2>, scalar_prefetch = 0 : i64, scratch_operands = 0 : i64, tpu.core_type = #tpu.core_type<tc>, window_params = [{transform_indices = @transform_0, window_bounds = array<i64: 64, 10>}, {pipeline_mode = #tpu.pipeline_mode<synchronous>, transform_indices = @transform_1, window_bounds = array<i64: 10, 128>}, {pipeline_mode = #tpu.pipeline_mode<synchronous>, transform_indices = @transform_2, window_bounds = array<i64: 1, 128>}, {pipeline_mode = #tpu.pipeline_mode<synchronous>, transform_indices = @transform_3, window_bounds = array<i64: 128, 128>}, {pipeline_mode = #tpu.pipeline_mode<synchronous>, transform_indices = @transform_4, window_bounds = array<i64: 1, 4>}, {transform_indices = @transform_5, window_bounds = array<i64: 64, 4>}]} {
    %c0 = arith.constant 0 : index
    %c0_0 = arith.constant 0 : index
    %0 = vector.load %arg1[%c0, %c0_0] : memref<64x10xbf16, #tpu.memory_space<vmem>>, vector<64x10xbf16>
    %c0_1 = arith.constant 0 : index
    %c0_2 = arith.constant 0 : index
    %1 = vector.load %arg2[%c0_1, %c0_2] : memref<10x128xbf16, #tpu.memory_space<vmem>>, vector<10x128xbf16>
    %cst = arith.constant dense<0.000000e+00> : vector<64x128xf32>
    %2 = tpu.matmul %0, %1, %cst {dimension_numbers = #tpu.dot_dimension_numbers<[1], [0], [0], [1], [0, 0, 1, 1], [], []>} : vector<64x10xbf16>, vector<10x128xbf16>, vector<64x128xf32> -> vector<64x128xf32>
    %c0_3 = arith.constant 0 : index
    %c0_4 = arith.constant 0 : index
    %3 = vector.load %arg3[%c0_3, %c0_4] : memref<1x128xf32, #tpu.memory_space<vmem>>, vector<1x128xf32>
    %4 = vector.broadcast %3 : vector<1x128xf32> to vector<64x128xf32>
    %5 = arith.addf %2, %4 : vector<64x128xf32>
    %6 = arith.negf %5 : vector<64x128xf32>
    %7 = math.exp %6 : vector<64x128xf32>
    %cst_5 = arith.constant 1.000000e+00 : f32
    %8 = vector.broadcast %cst_5 : f32 to vector<64x128xf32>
    %9 = arith.addf %8, %7 : vector<64x128xf32>
    %10 = arith.divf %8, %9 : vector<64x128xf32>
    %11 = arith.truncf %10 : vector<64x128xf32> to vector<64x128xbf16>
    %c0_6 = arith.constant 0 : index
    %c0_7 = arith.constant 0 : index
    %12 = vector.load %arg4[%c0_6, %c0_7] : memref<128x128xbf16, #tpu.memory_space<vmem>>, vector<128x128xbf16>
    %cst_8 = arith.constant dense<0.000000e+00> : vector<64x128xf32>
    %13 = tpu.matmul %11, %12, %cst_8 {dimension_numbers = #tpu.dot_dimension_numbers<[1], [0], [0], [1], [0, 0, 1, 1], [], []>} : vector<64x128xbf16>, vector<128x128xbf16>, vector<64x128xf32> -> vector<64x128xf32>
    %14 = vector.extract_strided_slice %13 {offsets = [0, 0], sizes = [64, 4], strides = [1, 1]} : vector<64x128xf32> to vector<64x4xf32>
    %c0_9 = arith.constant 0 : index
    %c0_10 = arith.constant 0 : index
    %15 = vector.load %arg5[%c0_9, %c0_10] : memref<1x4xf32, #tpu.memory_space<vmem>>, vector<1x4xf32>
    %16 = vector.broadcast %15 : vector<1x4xf32> to vector<64x4xf32>
    %17 = arith.addf %14, %16 : vector<64x4xf32>
    %c0_11 = arith.constant 0 : index
    %c0_12 = arith.constant 0 : index
    %18 = vector.load %arg6[%c0_11, %c0_12] : memref<64x4xf32, #tpu.memory_space<vmem>>, vector<64x4xf32>
    tpu.vector_store %arg6[%c0_11, %c0_12], %17 {strides = array<i32>} : memref<64x4xf32, #tpu.memory_space<vmem>>, vector<64x4xf32>,
    return
  }
  func.func @transform_0(%arg0: i32) -> (i32, i32) {
    %c0_i32 = arith.constant 0 : i32
    %c0_i32_0 = arith.constant 0 : i32
    return %arg0, %c0_i32 : i32, i32
  }
  func.func @transform_1(%arg0: i32) -> (i32, i32) {
    %c0_i32 = arith.constant 0 : i32
    %c0_i32_0 = arith.constant 0 : i32
    %c0_i32_1 = arith.constant 0 : i32
    return %c0_i32, %c0_i32_0 : i32, i32
  }
  func.func @transform_2(%arg0: i32) -> (i32, i32) {
    %c0_i32 = arith.constant 0 : i32
    %c0_i32_0 = arith.constant 0 : i32
    %c0_i32_1 = arith.constant 0 : i32
    return %c0_i32, %c0_i32_0 : i32, i32
  }
  func.func @transform_3(%arg0: i32) -> (i32, i32) {
    %c0_i32 = arith.constant 0 : i32
    %c0_i32_0 = arith.constant 0 : i32
    %c0_i32_1 = arith.constant 0 : i32
    return %c0_i32, %c0_i32_0 : i32, i32
  }
  func.func @transform_4(%arg0: i32) -> (i32, i32) {
    %c0_i32 = arith.constant 0 : i32
    %c0_i32_0 = arith.constant 0 : i32
    %c0_i32_1 = arith.constant 0 : i32
    return %c0_i32, %c0_i32_0 : i32, i32
  }
  func.func @transform_5(%arg0: i32) -> (i32, i32) {
    %c0_i32 = arith.constant 0 : i32
    %c0_i32_0 = arith.constant 0 : i32
    return %arg0, %c0_i32 : i32, i32
  }
}

</mosaic_0001>

<bundles_post_ra>
// kernel: tpu_custom_call.1
= control target key start
LH: loop header
LB: loop body
LE: loop exit
PB: predicated region body
PF: predicated region fallthrough
CT: control target
= control target key end

     0   :  { %s811_s18 = smov 0   ;;  %s873_s0 = inlined_call_operand.vmem [shape: bf16[128,10], index: 0, kind: input, shape index: {}]   ;;  %s874_s1 = inlined_call_operand.vmem [shape: bf16[10,128], index: 1, kind: input, shape index: {}]   ;;  %s875_s2 = inlined_call_operand.vmem [shape: f32[1,128], index: 2, kind: input, shape index: {}]   ;;  %s876_s3 = inlined_call_operand.vmem [shape: bf16[128,128], index: 3, kind: input, shape index: {}]   ;;  %s877_s4 = inlined_call_operand.vmem [shape: f32[1,4], index: 4, kind: input, shape index: {}]   ;;  %s878_s5 = inlined_call_operand.vmem [shape: f32[128,4], index: 5, kind: output, shape index: {}]  }
   0x1 LB: > { %s614_s19 = sadd.s32 4294967295, %s779_s18   ;;  %p618_p0 = scmp.ge.s32.totalorder %s779_s18, 1  ;;  %s779_s18 = sphi %s811_s18, %s15_s18  }
   0x2   : > { %p188_p1 = scmp.lt.s32.totalorder %s779_s18, 3 }
   0x4   : > { %p189_p2 = pnand %p618_p0, %p188_p1 }
   0x5   : > { %s619_s22 = sshll.u32 (!%p189_p2), %s614_s19, 3 }
   0x6   : > { %192 = sbr.rel (%p189_p2) target bundleno = 462 (0x1ce), region = 40  ;;  %p217_p3 = scmp.lt.s32.totalorder (!%p189_p2), %s619_s22, 15 }
   0xb   : > { %v728_v0 = vld [vmem:[%s874_s1] sm:$0x1f]   ;;  %vm284_vm0 = vcmask 1044480   ;;  %s880_s22 = smov (!%p217_p3, %s619_s22), 15  ;;  %vm271_vm1 = vcmask 80896   ;;  %v733_v6 = vld [vmem:[%s876_s3 + $0x38] sm:$0xff]  }
   0xc   : > { %719 = vmatprep.subr.msk.bf16.mxu0 %vm284_vm0, %v728_v0  ;;  %v286_v1 = vsel %vm284_vm0, %v728_v0, 0  ;;  %s620_s23 = sshll.u32 %s880_s22, 2  ;;  %703 = vmatprep.subr.bf16.mxu1 %v733_v6  ;;  %v734_v7 = vld [vmem:[%s876_s3 + $0x30] sm:$0xff]   ;;  %v735_v8 = vld [vmem:[%s876_s3 + $0x28] sm:$0xff]   ;;  %v736_v9 = vld [vmem:[%s876_s3 + $0x20] sm:$0xff]   ;;  %s622_s21 = sshll.u32 %s880_s22, 3 }
   0xd   : > { %670 = vmatpush3.bf16.msra.mxu0 %v286_v1  ;;  %s220_s26 = scalar_lea.vmem %s873_s0, %s620_s23  ;;  %711 = vmatpush3.bf16.msra.mxu1 %v733_v6  ;;  %v737_v10 = vld [vmem:[%s876_s3 + $0x18] sm:$0xff]   ;;  %v738_v11 = vld [vmem:[%s876_s3 + $0x10] sm:$0xff]   ;;  %v739_v12 = vld [vmem:[%s876_s3 + $0x8] sm:$0xff]   ;;  %s226_s27 = scalar_lea.vmem %s878_s5, %s622_s21  ;;  %vm549_vm2 = vcmask 31744  }
   0xe   : > { %v729_v2 = vld [vmem:[%s220_s26] sm:$0xff]   ;;  %v730_v3 = vld [vmem:[%s220_s26 + $0x8] sm:$0xff]   ;;  %v731_v4 = vld [vmem:[%s220_s26 + $0x10] sm:$0xff]   ;;  %679 = vmatprep.subr.bf16.mxu0 %v733_v6  ;;  %704 = vmatprep.subr.bf16.mxu1 %v734_v7 }
   0xf   : > { %671 = vmatprep.mubr.msk.bf16.mxu0 %vm271_vm1, %v729_v2  ;;  %v732_v5 = vld [vmem:[%s220_s26 + $0x18] sm:$0xff]   ;;  %v740_v13 = vld [vmem:[%s876_s3] sm:$0xff]  }
  0x10   : > { %672 = vmatmul.mubr.msk.bf16.vlgmr.msra.gmra.mxu0 %vm271_vm1, %v730_v3  ;;  %v623_v14 = vld [vmem:[%s875_s2] ss:$0 sm:$0xff] }
  0x11   : > { %675 = vmatprep.mubr.msk.bf16.mxu0 %vm271_vm1, %v731_v4  ;;  %680 = vmatpush3.bf16.msra.mxu0 %v733_v6  ;;  %v649_v3 = vld [vmem:[%s877_s4] ss:$0 sm:$0xff] }
  0x12   : > { %681 = vmatprep.subr.bf16.mxu0 %v734_v7  ;;  %712 = vmatpush3.bf16.msra.mxu1 %v734_v7 }
  0x13   : > { %705 = vmatprep.subr.bf16.mxu1 %v735_v8 }
  0x15   : > { %682 = vmatpush3.bf16.msra.mxu0 %v734_v7 }
  0x16   : > { %683 = vmatprep.subr.bf16.mxu0 %v735_v8  ;;  %713 = vmatpush3.bf16.msra.mxu1 %v735_v8 }
  0x17   : > { %706 = vmatprep.subr.bf16.mxu1 %v736_v9 }
  0x18   : > { %676 = vmatmul.mubr.msk.bf16.gmra.mxu0 %vm271_vm1, %v732_v5 }
  0x19   : > { %684 = vmatpush3.bf16.msra.mxu0 %v735_v8 }
  0x1a   : > { %685 = vmatprep.subr.bf16.mxu0 %v736_v9  ;;  %714 = vmatpush3.bf16.msra.mxu1 %v736_v9 }
  0x1b   : > { %707 = vmatprep.subr.bf16.mxu1 %v737_v10 }
  0x1d   : > { %686 = vmatpush3.bf16.msra.mxu0 %v736_v9 }
  0x1e   : > { %687 = vmatprep.subr.bf16.mxu0 %v737_v10  ;;  %715 = vmatpush3.bf16.msra.mxu1 %v737_v10 }
  0x1f   : > { %708 = vmatprep.subr.bf16.mxu1 %v738_v11 }
  0x21   : > { %688 = vmatpush3.bf16.msra.mxu0 %v737_v10 }
  0x22   : > { %689 = vmatprep.subr.bf16.mxu0 %v738_v11  ;;  %716 = vmatpush3.bf16.msra.mxu1 %v738_v11 }
  0x23   : > { %709 = vmatprep.subr.bf16.mxu1 %v739_v12 }
  0x25   : > { %690 = vmatpush3.bf16.msra.mxu0 %v738_v11 }
  0x26   : > { %691 = vmatprep.subr.bf16.mxu0 %v739_v12  ;;  %717 = vmatpush3.bf16.msra.mxu1 %v739_v12 }
  0x27   : > { %710 = vmatprep.subr.bf16.mxu1 %v740_v13 }
  0x29   : > { %692 = vmatpush3.bf16.msra.mxu0 %v739_v12 }
  0x2a   : > { %693 = vmatprep.subr.bf16.mxu0 %v740_v13  ;;  %718 = vmatpush3.bf16.msra.mxu1 %v740_v13 }
  0x2d   : > { %694 = vmatpush3.bf16.msra.mxu0 %v740_v13 }
  0xd0   : > { %v673_v15 = vpop.f32.mrf.mxu0 }
  0xd1   : > { %v331_v16 = vadd.f32 %v673_v15, %v623_v14 }
  0xd2   : > { %v322_v17 = vpop.f32.mrf.mxu0 }
  0xd3   : > { %v323_v18 = vadd.f32 %v623_v14, %v322_v17  ;;  %v635_v19 = vmul.f32 -1.442695, %v331_v16 }
  0xd4   : > { %v674_v20 = vpop.f32.mrf.mxu0 }
  0xd5   : > { %v633_v21 = vmul.f32 -1.442695, %v323_v18  ;;  %v334_v22 = vadd.f32 %v674_v20, %v623_v14 }
  0xd6   : > { %v325_v23 = vpop.f32.mrf.mxu0 }
  0xd7   : > { %741 = vpow2.f32 %v633_v21  ;;  %v636_v24 = vmul.f32 -1.442695, %v334_v22  ;;  %v326_v25 = vadd.f32 %v623_v14, %v325_v23 }
  0xd8   : > { %743 = vpow2.f32 %v635_v19  ;;  %v677_v26 = vpop.f32.mrf.mxu0 }
  0xd9   : > { %745 = vpow2.f32 %v636_v24  ;;  %v634_v27 = vmul.f32 -1.442695, %v326_v25  ;;  %v347_v28 = vadd.f32 %v677_v26, %v623_v14 }
  0xda   : > { %v338_v29 = vpop.f32.mrf.mxu0 }
  0xdb   : > { %747 = vpow2.f32 %v634_v27  ;;  %v339_v30 = vadd.f32 %v623_v14, %v338_v29  ;;  %v639_v31 = vmul.f32 -1.442695, %v347_v28 }
  0xdc   : > { %v678_v32 = vpop.f32.mrf.mxu0 }
  0xdd   : > { %v637_v33 = vmul.f32 -1.442695, %v339_v30  ;;  %v350_v34 = vadd.f32 %v678_v32, %v623_v14 }
  0xde   : > { %v341_v35 = vpop.f32.mrf.mxu0 }
  0xdf   : > { %749 = vpow2.f32 %v637_v33  ;;  %v640_v36 = vmul.f32 -1.442695, %v350_v34  ;;  %v342_v37 = vadd.f32 %v623_v14, %v341_v35 }
  0xe0   : > { %751 = vpow2.f32 %v639_v31 }
  0xe1   : > { %753 = vpow2.f32 %v640_v36  ;;  %v638_v38 = vmul.f32 -1.442695, %v342_v37 }
  0xe3   : > { %755 = vpow2.f32 %v638_v38 }
  0xe4   : > { %v742_v39 = vpop.eup %741 }
  0xe5   : > { %v744_v40 = vpop.eup %743  ;;  %v377_v41 = vadd.f32 1.0, %v742_v39 }
  0xe6   : > { %v746_v42 = vpop.eup %745  ;;  %v379_v45 = vadd.f32 1.0, %v744_v40 }
  0xe7   : > { %v380_v43 = vadd.f32 1.0, %v746_v42  ;;  %757 = vrcp.f32 %v377_v41 }
  0xe8   : > { %v748_v44 = vpop.eup %747 }
  0xe9   : > { %v378_v46 = vadd.f32 1.0, %v748_v44  ;;  %759 = vrcp.f32 %v380_v43 }
  0xeb   : > { %761 = vrcp.f32 %v378_v46 }
  0xec   : > { %v750_v47 = vpop.eup %749  ;;  %763 = vrcp.f32 %v379_v45 }
  0xed   : > { %v752_v48 = vpop.eup %751  ;;  %v381_v49 = vadd.f32 1.0, %v750_v47 }
  0xee   : > { %v754_v50 = vpop.eup %753  ;;  %v383_v53 = vadd.f32 1.0, %v752_v48 }
  0xef   : > { %v384_v51 = vadd.f32 1.0, %v754_v50  ;;  %765 = vrcp.f32 %v381_v49 }
  0xf0   : > { %v756_v52 = vpop.eup %755 }
  0xf1   : > { %v382_v54 = vadd.f32 1.0, %v756_v52  ;;  %767 = vrcp.f32 %v384_v51 }
  0xf3   : > { %769 = vrcp.f32 %v382_v54 }
  0xf4   : > { %771 = vrcp.f32 %v383_v53  ;;  %v758_v55 = vpop.eup %757 }
  0xf6   : > { %v760_v56 = vpop.eup %759 }
  0xf8   : > { %v762_v57 = vpop.eup %761 }
  0xf9   : > { %v764_v58 = vpop.eup %763  ;;  %v401_v59 = vpack.c.bf16 %v762_v57, %v758_v55 }
  0xfa   : > { %v402_v60 = vpack.c.bf16 %v760_v56, %v764_v58 }
  0xfb   : > { %695 = vmatprep.mubr.bf16.mxu0 %v401_v59 }
  0xfc   : > { %696 = vmatmul.mubr.bf16.vlgmr.msra.gmra.mxu0 %v402_v60  ;;  %v766_v61 = vpop.eup %765 }
  0xfe   : > { %v768_v62 = vpop.eup %767 }
 0x100   : > { %v770_v63 = vpop.eup %769 }
 0x101   : > { %v772_v0 = vpop.eup %771  ;;  %v403_v1 = vpack.c.bf16 %v770_v63, %v766_v61 }
 0x102   : > { %v404_v2 = vpack.c.bf16 %v768_v62, %v772_v0 }
 0x103   : > { %699 = vmatprep.mubr.bf16.mxu1 %v403_v1 }
 0x104   : > { %700 = vmatmul.mubr.bf16.vlgmr.msra.gmra.mxu1 %v404_v2 }
 0x1bc   : > { %v697_v4 = vpop.f32.mrf.mxu0 }
 0x1bd   : > { %v543_v5 = vadd.f32 %v697_v4, %v649_v3 }
 0x1be   : > { %v503_v6 = vpop.f32.mrf.mxu0 }
 0x1bf   : > { %552 = vst.msk [vmem:[%s226_s27 + $0x10] sm:$0xff] %vm549_vm2, %v543_v5  ;;  %v541_v7 = vadd.f32 %v649_v3, %v503_v6 }
 0x1c0   : > { %v698_v8 = vpop.f32.mrf.mxu0 }
 0x1c1   : > { %550 = vst.msk [vmem:[%s226_s27] sm:$0xff] %vm549_vm2, %v541_v7  ;;  %v544_v9 = vadd.f32 %v698_v8, %v649_v3 }
 0x1c2   : > { %v506_v10 = vpop.f32.mrf.mxu0 }
 0x1c3   : > { %553 = vst.msk [vmem:[%s226_s27 + $0x18] sm:$0xff] %vm549_vm2, %v544_v9  ;;  %v542_v11 = vadd.f32 %v649_v3, %v506_v10 }
 0x1c4   : > { %v701_v12 = vpop.f32.mrf.mxu1 }
 0x1c5   : > { %551 = vst.msk [vmem:[%s226_s27 + $0x8] sm:$0xff] %vm549_vm2, %v542_v11  ;;  %v547_v13 = vadd.f32 %v701_v12, %v649_v3 }
 0x1c6   : > { %v519_v14 = vpop.f32.mrf.mxu1 }
 0x1c7   : > { %556 = vst.msk [vmem:[%s226_s27 + $0x30] sm:$0xff] %vm549_vm2, %v547_v13  ;;  %v545_v15 = vadd.f32 %v649_v3, %v519_v14 }
 0x1c8   : > { %v702_v16 = vpop.f32.mrf.mxu1 }
 0x1c9   : > { %554 = vst.msk [vmem:[%s226_s27 + $0x20] sm:$0xff] %vm549_vm2, %v545_v15  ;;  %v548_v17 = vadd.f32 %v702_v16, %v649_v3 }
 0x1ca   : > { %v522_v18 = vpop.f32.mrf.mxu1 }
 0x1cb   : > { %557 = vst.msk [vmem:[%s226_s27 + $0x38] sm:$0xff] %vm549_vm2, %v548_v17  ;;  %v546_v19 = vadd.f32 %v649_v3, %v522_v18 }
 0x1cd   : > { %555 = vst.msk [vmem:[%s226_s27 + $0x28] sm:$0xff] %vm549_vm2, %v546_v19 }
 0x1ce PF: > { %s15_s18 = sadd.s32 1, %s779_s18  }
 0x1cf   : > { %p12_p4 = scmp.ge.s32.totalorder %s15_s18, 4  }
 0x1d1   :  { %14 = sbr.rel (!%p12_p4) target bundleno = 1 (0x1), region = 70 }

</bundles_post_ra>
